<compile_context>
chip_gen: v7x
topology: tpu7x:2x2x1
jax: 0.10.0
libtpu: 0.0.40
codegen_flags: <defaults>
</compile_context>

<pallas_src>
import jax
import jax.numpy as jnp
from jax.experimental import pallas as pl
from jax.experimental.pallas import tpu as pltpu

_IN = 64    # fc1 in_features
_HID = 64   # fc1 out_features


def _round_up(n, m):
    return ((n + m - 1) // m) * m


def _device_kind():
    try:
        return jax.devices()[0].device_kind.lower()
    except Exception:
        return ""


def _make_kernel(layer2_on_mxu, mxu_dtype):
    def kernel(x_ref, w1_ref, b1_ref, w2_ref, b2_ref, o_ref):
        # Layer 1 on the MXU; the x tile is cast in-kernel (free under DMA/MXU),
        # f32 accumulation regardless of operand dtype.
        x = x_ref[...].astype(mxu_dtype)
        h = jnp.dot(x, w1_ref[...], preferred_element_type=jnp.float32)
        h = jnp.maximum(h + b1_ref[...], 0.0)                      # [T, 64] f32 (VPU)
        if layer2_on_mxu:
            # v5e/v6e: one extra vmatmul per 8-row slab replaces ~6 XLU + ~8 VALU
            # ops of the lane reduce; MXU has plenty of slack at K=N=64.
            out = jnp.dot(h.astype(mxu_dtype), w2_ref[...],
                          preferred_element_type=jnp.float32)      # [T, 1]
        else:
            # v7x: keep the second MXU pass off the critical path; w2 is a
            # broadcast row, VPU multiply + XLU lane reduce.
            out = jnp.sum(h * w2_ref[...], axis=-1, keepdims=True)  # [T, 1]
        o_ref[...] = (out + b2_ref[0, 0]).astype(o_ref.dtype)
    return kernel


def rejection_model_forward(x, w1, b1, w2, b2, *,
                            mxu_dtype=jnp.bfloat16,
                            tile_b_max=None,
                            min_grid_steps=None,
                            layer2_on_mxu=None,
                            x_pipeline_buffers=2):
    """Forward pass of RejectionModel: relu(x @ w1 + b1) @ w2 + b2.

    x  : [B, 64]   inputs (kept in native dtype in HBM; cast in-kernel for the MXU)
    w1 : [64, 64]  fc1 weight stored [in, out]
    b1 : [1, 64]   fc1 bias
    w2 : [64, 1]   fc2 weight stored [in, out]
    b2 : [1, 1]    fc2 bias
    Returns [B, 1] float32.
    """
    B = x.shape[0]
    assert x.shape[1] == _IN

    is_v7 = "v7" in _device_kind()
    if tile_b_max is None:
        tile_b_max = 2048 if is_v7 else 8192          # big tiles amortize step cost
    if min_grid_steps is None:
        min_grid_steps = 4 if is_v7 else 1            # even split over 2 TCs on v7x
    if layer2_on_mxu is None:
        layer2_on_mxu = not is_v7                     # crit-unit regime differs

    # Sublane alignment: 8 rows for 32-bit x, 16 for 16-bit x in HBM.
    align = 8 if jnp.dtype(x.dtype).itemsize >= 4 else 16
    tile_b_max = max(align, (tile_b_max // align) * align)
    steps = max(min_grid_steps, 1)

    if B <= tile_b_max and steps == 1:
        tile_b = B                                    # one full-array block, no masking
    else:
        tile_b = min(tile_b_max, _round_up(pl.cdiv(B, steps), align))
        if B >= align:
            tile_b = min(tile_b, (B // align) * align)  # block never exceeds array
        else:
            tile_b = B                                   # tiny batch: full-dim block
    grid = (pl.cdiv(B, tile_b),)

    # Resident operands (tiny, one-time wrapper cast; loaded once and kept in VMEM).
    w1_c = w1.astype(mxu_dtype)                                   # [64, 64]
    b1_r = b1.reshape(1, _HID).astype(jnp.float32)                # [1, 64]
    if layer2_on_mxu:
        w2_c = w2.reshape(_HID, 1).astype(mxu_dtype)              # [64, 1] column
        w2_spec = pl.BlockSpec((_HID, 1), lambda i: (0, 0))
    else:
        w2_c = w2.reshape(1, _HID).astype(jnp.float32)            # [1, 64] row
        w2_spec = pl.BlockSpec((1, _HID), lambda i: (0, 0))
    b2_s = b2.reshape(1, 1).astype(jnp.float32)

    # Optional deeper pipelining for x if exposed DMA latency is measured.
    if x_pipeline_buffers > 2 and grid[0] > 2:
        x_spec = pl.BlockSpec((tile_b, _IN), lambda i: (i, 0),
                              pipeline_mode=pl.Buffered(x_pipeline_buffers))
    else:
        x_spec = pl.BlockSpec((tile_b, _IN), lambda i: (i, 0))

    cost = pl.CostEstimate(
        flops=2 * B * _IN * _HID + 4 * B * _HID,
        transcendentals=0,
        bytes_accessed=int(x.size) * jnp.dtype(x.dtype).itemsize
        + int(w1_c.size) * jnp.dtype(w1_c.dtype).itemsize
        + int(b1_r.size + w2_c.size + b2_s.size) * 4
        + B * 4,
    )

    return pl.pallas_call(
        _make_kernel(layer2_on_mxu, mxu_dtype),
        out_shape=jax.ShapeDtypeStruct((B, 1), jnp.float32),
        grid=grid,
        in_specs=[
            x_spec,                                              # x: streamed per tile
            pl.BlockSpec((_IN, _HID), lambda i: (0, 0)),         # W1: resident in VMEM
            pl.BlockSpec((1, _HID), lambda i: (0, 0)),           # b1: resident
            w2_spec,                                             # w2: resident
            pl.BlockSpec(memory_space=pltpu.MemorySpace.SMEM),   # b2 scalar in SMEM
        ],
        out_specs=pl.BlockSpec((tile_b, 1), lambda i: (i, 0)),
        compiler_params=pltpu.CompilerParams(
            dimension_semantics=("parallel",),   # lets v7x shard tiles over 2 TCs
        ),
        cost_estimate=cost,
    )(x, w1_c, b1_r, w2_c, b2_s)


def _init_params(key):
    """Deterministic init matching PyTorch Linear shapes (stored transposed)."""
    k1, k2, k3, k4 = jax.random.split(key, 4)
    w1 = jax.random.uniform(k1, (64, 64), jnp.float32, -0.125, 0.125)
    b1 = jax.random.uniform(k2, (1, 64), jnp.float32, -0.125, 0.125)
    w2 = jax.random.uniform(k3, (64, 1), jnp.float32, -0.125, 0.125)
    b2 = jax.random.uniform(k4, (1, 1), jnp.float32, -0.125, 0.125)
    return w1, b1, w2, b2


if __name__ == "__main__":
    key = jax.random.PRNGKey(0)
    kx, kp, kx2 = jax.random.split(key, 3)
    w1, b1, w2, b2 = _init_params(kp)

    def ref_fwd(xv):
        return jnp.maximum(xv @ w1 + b1, 0.0) @ w2 + b2

    # Small batch, f32 end-to-end, both layer-2 paths (tight tolerance).
    B = 8
    x = jax.random.normal(kx, (B, 64), jnp.float32)
    r = ref_fwd(x)
    for l2mxu in (True, False):
        out = jax.block_until_ready(
            rejection_model_forward(x, w1, b1, w2, b2,
                                    mxu_dtype=jnp.float32, layer2_on_mxu=l2mxu))
        assert out.shape == (B, 1)
        assert jnp.allclose(out, r, atol=1e-5, rtol=1e-5)

    # Ragged batch, default per-generation config (bf16 MXU operands, f32 accum):
    # exercises resident weights, streamed x, no wrapper pad/cast.
    B2 = 2500
    x2 = jax.random.normal(kx2, (B2, 64), jnp.float32)
    r2 = ref_fwd(x2)
    out2 = jax.block_until_ready(rejection_model_forward(x2, w1, b1, w2, b2))
    assert out2.shape == (B2, 1)
    assert jnp.allclose(out2, r2, atol=5e-2, rtol=5e-2)

    # Force a multi-step grid with a masked partial last block + MXU layer-2 path,
    # f32 operands for an exact check of the masking path.
    out3 = jax.block_until_ready(
        rejection_model_forward(x2, w1, b1, w2, b2,
                                mxu_dtype=jnp.float32, tile_b_max=1024,
                                min_grid_steps=4, layer2_on_mxu=True))
    assert out3.shape == (B2, 1)
    assert jnp.allclose(out3, r2, atol=1e-5, rtol=1e-5)

    print("KERNEL_OK")
</pallas_src>

<mosaic_0001>
module attributes {stable_mosaic.version = 11 : i64} {
  func.func @kernel(%arg0: i32, %arg1: memref<8x64xf32, #tpu.memory_space<vmem>>, %arg2: memref<64x64xf32, #tpu.memory_space<vmem>>, %arg3: memref<1x64xf32, #tpu.memory_space<vmem>>, %arg4: memref<64x1xf32, #tpu.memory_space<vmem>>, %arg5: memref<1x1xf32, #tpu.memory_space<smem>>, %arg6: memref<8x1xf32, #tpu.memory_space<vmem>>) attributes {dimension_semantics = [#tpu.dimension_semantics<parallel>], iteration_bounds = array<i64: 1>, scalar_prefetch = 0 : i64, scratch_operands = 0 : i64, tpu.core_type = #tpu.core_type<tc>, window_params = [{transform_indices = @transform_0, window_bounds = array<i64: 8, 64>}, {pipeline_mode = #tpu.pipeline_mode<synchronous>, transform_indices = @transform_1, window_bounds = array<i64: 64, 64>}, {pipeline_mode = #tpu.pipeline_mode<synchronous>, transform_indices = @transform_2, window_bounds = array<i64: 1, 64>}, {pipeline_mode = #tpu.pipeline_mode<synchronous>, transform_indices = @transform_3, window_bounds = array<i64: 64, 1>}, {transform_indices = @transform_4, window_bounds = array<i64: 1, 1>}, {transform_indices = @transform_5, window_bounds = array<i64: 8, 1>}]} {
    %c0 = arith.constant 0 : index
    %c0_0 = arith.constant 0 : index
    %0 = vector.load %arg1[%c0, %c0_0] : memref<8x64xf32, #tpu.memory_space<vmem>>, vector<8x64xf32>
    %c0_1 = arith.constant 0 : index
    %c0_2 = arith.constant 0 : index
    %1 = vector.load %arg2[%c0_1, %c0_2] : memref<64x64xf32, #tpu.memory_space<vmem>>, vector<64x64xf32>
    %cst = arith.constant dense<0.000000e+00> : vector<8x64xf32>
    %2 = tpu.matmul %0, %1, %cst {dimension_numbers = #tpu.dot_dimension_numbers<[1], [0], [0], [1], [0, 0, 1, 1], [], []>} : vector<8x64xf32>, vector<64x64xf32>, vector<8x64xf32> -> vector<8x64xf32>
    %c0_3 = arith.constant 0 : index
    %c0_4 = arith.constant 0 : index
    %3 = vector.load %arg3[%c0_3, %c0_4] : memref<1x64xf32, #tpu.memory_space<vmem>>, vector<1x64xf32>
    %4 = vector.broadcast %3 : vector<1x64xf32> to vector<8x64xf32>
    %5 = arith.addf %2, %4 : vector<8x64xf32>
    %cst_5 = arith.constant 0.000000e+00 : f32
    %6 = vector.broadcast %cst_5 : f32 to vector<8x64xf32>
    %7 = arith.maximumf %5, %6 : vector<8x64xf32>
    %c0_6 = arith.constant 0 : index
    %c0_7 = arith.constant 0 : index
    %8 = vector.load %arg4[%c0_6, %c0_7] : memref<64x1xf32, #tpu.memory_space<vmem>>, vector<64x1xf32>
    %cst_8 = arith.constant dense<0.000000e+00> : vector<8x1xf32>
    %9 = tpu.matmul %7, %8, %cst_8 {dimension_numbers = #tpu.dot_dimension_numbers<[1], [0], [0], [1], [0, 0, 1, 1], [], []>} : vector<8x64xf32>, vector<64x1xf32>, vector<8x1xf32> -> vector<8x1xf32>
    %c0_9 = arith.constant 0 : index
    %c0_10 = arith.constant 0 : index
    %10 = memref.load %arg5[%c0_9, %c0_10] : memref<1x1xf32, #tpu.memory_space<smem>>
    %11 = vector.broadcast %10 : f32 to vector<8x1xf32>
    %12 = arith.addf %9, %11 : vector<8x1xf32>
    %c0_11 = arith.constant 0 : index
    %c0_12 = arith.constant 0 : index
    %13 = vector.load %arg6[%c0_11, %c0_12] : memref<8x1xf32, #tpu.memory_space<vmem>>, vector<8x1xf32>
    tpu.vector_store %arg6[%c0_11, %c0_12], %12 {strides = array<i32>} : memref<8x1xf32, #tpu.memory_space<vmem>>, vector<8x1xf32>,
    return
  }
  func.func @transform_0(%arg0: i32) -> (i32, i32) {
    %c0_i32 = arith.constant 0 : i32
    %c0_i32_0 = arith.constant 0 : i32
    return %arg0, %c0_i32 : i32, i32
  }
  func.func @transform_1(%arg0: i32) -> (i32, i32) {
    %c0_i32 = arith.constant 0 : i32
    %c0_i32_0 = arith.constant 0 : i32
    %c0_i32_1 = arith.constant 0 : i32
    return %c0_i32, %c0_i32_0 : i32, i32
  }
  func.func @transform_2(%arg0: i32) -> (i32, i32) {
    %c0_i32 = arith.constant 0 : i32
    %c0_i32_0 = arith.constant 0 : i32
    %c0_i32_1 = arith.constant 0 : i32
    return %c0_i32, %c0_i32_0 : i32, i32
  }
  func.func @transform_3(%arg0: i32) -> (i32, i32) {
    %c0_i32 = arith.constant 0 : i32
    %c0_i32_0 = arith.constant 0 : i32
    %c0_i32_1 = arith.constant 0 : i32
    return %c0_i32, %c0_i32_0 : i32, i32
  }
  func.func @transform_4(%arg0: i32) -> (i32, i32) {
    %c0_i32 = arith.constant 0 : i32
    %c0_i32_0 = arith.constant 0 : i32
    %c0_i32_1 = arith.constant 0 : i32
    return %c0_i32, %c0_i32_0 : i32, i32
  }
  func.func @transform_5(%arg0: i32) -> (i32, i32) {
    %c0_i32 = arith.constant 0 : i32
    %c0_i32_0 = arith.constant 0 : i32
    return %arg0, %c0_i32 : i32, i32
  }
}

</mosaic_0001>

<bundles_post_ra>
// kernel: tpu_custom_call.1
= control target key start
LH: loop header
LB: loop body
LE: loop exit
PB: predicated region body
PF: predicated region fallthrough
CT: control target
= control target key end

     0   :  { %v287_v0 = vmov 0.0|0.0   ;;  %vm288_vm0 = vmmov 0   ;;  %v289_v4 = vmov 0.0   ;;  %vm37_vm1 = vcmask 523264   ;;  %s380_s1 = inlined_call_operand.vmem [shape: f32[64,64], index: 1, kind: input, shape index: {}]   ;;  %s381_s3 = inlined_call_operand.vmem [shape: f32[64,1], index: 3, kind: input, shape index: {}]   ;;  %s382_s0 = inlined_call_operand.vmem [shape: f32[8,64], index: 0, kind: input, shape index: {}]   ;;  %s383_s2 = inlined_call_operand.vmem [shape: f32[1,64], index: 2, kind: input, shape index: {}]   ;;  %s384_s4 = inlined_call_operand.<no memory space> [shape: f32[1,1], index: 4, kind: input, shape index: {}]   ;;  %s385_s5 = inlined_call_operand.vmem [shape: f32[8,1], index: 5, kind: output, shape index: {}]  }
   0x1   :  { %260 = vmatprep.subr.bf16.mxu0 %v287_v0  ;;  %v22_v1 = vld [vmem:[%s380_s1] sm:$0xff]  ;;  %v23_v2 = vld [vmem:[%s380_s1 + $0x8] sm:$0xff]  ;;  %v24_v3 = vld [vmem:[%s380_s1 + $0x10] sm:$0xff]  ;;  %238 = vmatprep.mubr.msk.f32.mxu0 %vm288_vm0, %v289_v4  ;;  %v121_v32 = vstv %s384_s4  ;;  %vm195_vm2 = vcmask 7168  }
   0x2   :  { %v261_v5 = vpack.c.bf16 %v23_v2, %v22_v1  ;;  %v25_v6 = vld [vmem:[%s380_s1 + $0x18] sm:$0xff]  ;;  %272 = vmatprep.subr.bf16.mxu1 %v287_v0  ;;  %257 = vmatprep.mubr.msk.f32.mxu1 %vm288_vm0, %v289_v4  ;;  %v112_v8 = vld [vmem:[%s381_s3] sm:$0xff]  ;;  %v113_v9 = vld [vmem:[%s381_s3 + $0x8] sm:$0xff] }
   0x3   :  { %v264_v7 = vpack.c.bf16 %v25_v6, %v24_v3  ;;  %v114_v10 = vld [vmem:[%s381_s3 + $0x10] sm:$0xff]  ;;  %v26_v11 = vld [vmem:[%s380_s1 + $0x20] sm:$0xff]  ;;  %v27_v12 = vld [vmem:[%s380_s1 + $0x28] sm:$0xff]  ;;  %v273_v13 = vpack.c.bf16 %v113_v9, %v112_v8 }
   0x4   :  { %262 = vmatpush3.bf16.msra.mxu0 %v261_v5  ;;  %v115_v14 = vld [vmem:[%s381_s3 + $0x18] sm:$0xff]  ;;  %v267_v16 = vpack.c.bf16 %v27_v12, %v26_v11  ;;  %v116_v17 = vld [vmem:[%s381_s3 + $0x20] sm:$0xff]  ;;  %v117_v18 = vld [vmem:[%s381_s3 + $0x28] sm:$0xff] }
   0x5   :  { %263 = vmatprep.subr.bf16.mxu0 %v287_v0  ;;  %274 = vmatpush3.bf16.msra.mxu1 %v273_v13  ;;  %v276_v15 = vpack.c.bf16 %v115_v14, %v114_v10  ;;  %v28_v19 = vld [vmem:[%s380_s1 + $0x30] sm:$0xff]  ;;  %v29_v20 = vld [vmem:[%s380_s1 + $0x38] sm:$0xff]  ;;  %v279_v21 = vpack.c.bf16 %v117_v18, %v116_v17  ;;  %v21_v23 = vld [vmem:[%s382_s0] sm:$0xff] }
   0x6   :  { %275 = vmatprep.subr.bf16.mxu1 %v287_v0  ;;  %v270_v22 = vpack.c.bf16 %v29_v20, %v28_v19  ;;  %v118_v24 = vld [vmem:[%s381_s3 + $0x30] sm:$0xff]  ;;  %v119_v25 = vld [vmem:[%s381_s3 + $0x38] sm:$0xff]  ;;  %v201_v27 = vld [vmem:[%s383_s2] ss:$0 sm:$0xff] }
   0x7   :  { %v282_v26 = vpack.c.bf16 %v119_v25, %v118_v24 }
   0x8   :  { %265 = vmatpush3.bf16.msra.mxu0 %v264_v7 }
   0x9   :  { %266 = vmatprep.subr.bf16.mxu0 %v287_v0  ;;  %277 = vmatpush3.bf16.msra.mxu1 %v276_v15 }
   0xa   :  { %278 = vmatprep.subr.bf16.mxu1 %v287_v0 }
   0xc   :  { %268 = vmatpush3.bf16.msra.mxu0 %v267_v16 }
   0xd   :  { %269 = vmatprep.subr.bf16.mxu0 %v287_v0  ;;  %280 = vmatpush3.bf16.msra.mxu1 %v279_v21 }
   0xe   :  { %281 = vmatprep.subr.bf16.mxu1 %v287_v0 }
  0x10   :  { %271 = vmatpush3.bf16.msra.mxu0 %v270_v22 }
  0x11   :  { %283 = vmatpush3.bf16.msra.mxu1 %v282_v26 }
  0x13   :  { %239 = vmatmul.mubr.msk.f32.vlgmr.msra.gmra.mrb[0].mxu0 %vm37_vm1, %v21_v23 }
  0xe6   :  { %v107_v28 = vpop.f32.mrb[0].mxu0 }
  0xe7   :  { %v108_v29 = vadd.f32 %v201_v27, %v107_v28  ;;  %v240_v30 = vpop.f32.mrb[1].mxu0 }
  0xe9   :  { %v111_v31 = vmax.f32 %v108_v29, 0.0 }
  0xeb   :  { %258 = vmatmul.mubr.msk.f32.vlgmr.msra.gmra.mrb[0].mxu1 %vm37_vm1, %v111_v31 }
 0x1be   :  { %v191_v33 = vpop.f32.mrb[0].mxu1 }
 0x1bf   :  { %v192_v34 = vadd.f32 %v191_v33, %v121_v32  ;;  %v259_v35 = vpop.f32.mrb[1].mxu1 }
 0x1c1   :  { %196 = vst.msk [vmem:[%s385_s5] sm:$0xff] %vm195_vm2, %v192_v34 }

</bundles_post_ra>
